<compile_context>
chip_gen: v7x
topology: tpu7x:2x2x1
jax: 0.10.0
libtpu: 0.0.40
codegen_flags: <defaults>
</compile_context>

<pallas_src>
import functools

import jax
import jax.numpy as jnp
from jax.experimental import pallas as pl
from jax.experimental.pallas import tpu as pltpu


# ----------------------------- kernels ---------------------------------------


def _kernel_fused(x_ref, w1_ref, b1_ref, w2_ref, b2_ref,
                  wd1_ref, bd1_ref, wd2_ref, bd2_ref, o_ref, *, act_dtype):
    # x_ref:   (tb, F) bf16          w1_ref: (F, 2*H2) bf16     b1_ref: (1, 2*H2) f32
    # w2_ref:  (2*H2, 2*H2) bf16     b2_ref: (1, 2*H2) f32
    # wd1_ref: (H2, H) bf16          bd1_ref:(1, H) f32
    # wd2_ref: (H, H) bf16           bd2_ref:(1, H) f32         o_ref: (tb, H)
    H2 = wd1_ref.shape[0]
    x = x_ref[...]

    # Encoder layer 1 (form + global fused as one block-diagonal matmul).
    h1 = jnp.dot(x, w1_ref[...], preferred_element_type=jnp.float32) + b1_ref[...]
    h1 = jnp.maximum(h1, 0.0).astype(act_dtype)
    # Dropout: identity (eval mode).  TODO(synk): training-mode dropout not implemented.

    # Encoder layer 2 (block-diagonal, single (tb,256)@(256,256) matmul).
    h2 = jnp.dot(h1.astype(jnp.bfloat16), w2_ref[...],
                 preferred_element_type=jnp.float32) + b2_ref[...]
    h2 = jnp.maximum(h2, 0.0)

    # Mean-aggregate the two branches: (form_part + global_part) / 2  -> (tb, H2).
    h_mid = (0.5 * (h2[:, :H2] + h2[:, H2:])).astype(jnp.bfloat16)

    # dense_encoder layer 1: Linear(H2, H) + ReLU.
    h3 = jnp.dot(h_mid, wd1_ref[...], preferred_element_type=jnp.float32) + bd1_ref[...]
    h3 = jnp.maximum(h3, 0.0).astype(act_dtype)

    # dense_encoder layer 2: Linear(H, H) + ReLU.
    h4 = jnp.dot(h3.astype(jnp.bfloat16), wd2_ref[...],
                 preferred_element_type=jnp.float32) + bd2_ref[...]
    h4 = jnp.maximum(h4, 0.0)

    o_ref[...] = h4.astype(o_ref.dtype)


def _kernel_split(x_ref, w1_ref, b1_ref, wf2_ref, bf2_ref, wg2_ref, bg2_ref,
                  wd1_ref, bd1_ref, wd2_ref, bd2_ref, o_ref, *, act_dtype):
    # Same as _kernel_fused, but encoder layer 2 is two (tb,128)@(128,128) matmuls
    # (better shape for 128x128 MXUs, half the layer-2 MXU work vs the block-diagonal form).
    H2 = wd1_ref.shape[0]
    x = x_ref[...]

    h1 = jnp.dot(x, w1_ref[...], preferred_element_type=jnp.float32) + b1_ref[...]
    h1 = jnp.maximum(h1, 0.0).astype(act_dtype)
    # Dropout: identity (eval mode).  TODO(synk): training-mode dropout not implemented.

    h1f = h1[:, :H2].astype(jnp.bfloat16)
    h1g = h1[:, H2:].astype(jnp.bfloat16)
    h2f = jnp.dot(h1f, wf2_ref[...], preferred_element_type=jnp.float32) + bf2_ref[...]
    h2f = jnp.maximum(h2f, 0.0)
    h2g = jnp.dot(h1g, wg2_ref[...], preferred_element_type=jnp.float32) + bg2_ref[...]
    h2g = jnp.maximum(h2g, 0.0)

    h_mid = (0.5 * (h2f + h2g)).astype(jnp.bfloat16)

    h3 = jnp.dot(h_mid, wd1_ref[...], preferred_element_type=jnp.float32) + bd1_ref[...]
    h3 = jnp.maximum(h3, 0.0).astype(act_dtype)

    h4 = jnp.dot(h3.astype(jnp.bfloat16), wd2_ref[...],
                 preferred_element_type=jnp.float32) + bd2_ref[...]
    h4 = jnp.maximum(h4, 0.0)

    o_ref[...] = h4.astype(o_ref.dtype)


# ----------------------------- wrapper ----------------------------------------


def _round_up(n, m):
    return ((n + m - 1) // m) * m


def _is_small_mxu_chip():
    """True for TPU generations with 128x128 MXUs / no bf16 VALU (v2-v5)."""
    try:
        kind = jax.devices()[0].device_kind.lower()
    except Exception:
        return False
    return any(t in kind for t in ("v2", "v3", "v4", "v5"))


def mlp_mean_agg_mlp(x, params, *, n_form=16, out_dtype=jnp.bfloat16,
                     block_batch=1024, split_encoder_l2=None,
                     bf16_intermediates=None):
    """x: (B, formula_dim) float32 (cast to bf16 internally).

    params: dict with
      "form":   (Wf1 (16, H2),  bf1 (H2,), Wf2 (H2, H2), bf2 (H2,))
      "global": (Wg1 (F-16,H2), bg1 (H2,), Wg2 (H2, H2), bg2 (H2,))
      "dense":  (Wd1 (H2, H),   bd1 (H,),  Wd2 (H, H),   bd2 (H,))
    Weights are stored (in, out), i.e. nn.Linear.weight.T.

    Note: weights are cast to bf16 (MXU-native) with f32 accumulation, so results differ
    slightly from a pure-f32 PyTorch forward.  Default output dtype is bf16.
    """
    small_mxu = _is_small_mxu_chip()
    if split_encoder_l2 is None:
        split_encoder_l2 = small_mxu          # v5e and older: 128x128 MXU
    if bf16_intermediates is None:
        bf16_intermediates = not small_mxu    # v6e/v7x: bf16 VALU
    act_dtype = jnp.bfloat16 if bf16_intermediates else jnp.float32

    wf1, bf1, wf2, bf2 = params["form"]
    wg1, bg1, wg2, bg2 = params["global"]
    wd1, bd1, wd2, bd2 = params["dense"]

    B, F = x.shape
    H2 = wf1.shape[1]
    H = wd1.shape[1]

    # --- Fuse the two encoder branch layer-1 weights into one block-diagonal matrix. ---
    w1_cat = jnp.zeros((F, 2 * H2), jnp.float32)
    w1_cat = w1_cat.at[:n_form, :H2].set(wf1)
    w1_cat = w1_cat.at[n_form:, H2:].set(wg1)
    w1_cat = w1_cat.astype(jnp.bfloat16)
    b1_cat = jnp.concatenate([bf1, bg1]).reshape(1, 2 * H2).astype(jnp.float32)

    wd1_b = wd1.astype(jnp.bfloat16)
    wd2_b = wd2.astype(jnp.bfloat16)
    bd1_r = bd1.reshape(1, H).astype(jnp.float32)
    bd2_r = bd2.reshape(1, H).astype(jnp.float32)

    # --- Cast x to bf16 in the wrapper (halves the input DMA). ---
    x = x.astype(jnp.bfloat16)

    # --- Batch tiling: 16-row granularity (bf16 sublane packing), >=2 grid steps when the
    #     batch allows (keeps v7x's 2nd TensorCore busy), pad Bp to a multiple of tb. ---
    SUB = 16
    Bp = _round_up(B, SUB)
    tb = min(block_batch, Bp)
    if pl.cdiv(Bp, tb) < 2 and Bp >= 2 * SUB:
        tb = _round_up(pl.cdiv(Bp, 2), SUB)
    Bp = pl.cdiv(Bp, tb) * tb  # every grid step is a full tile
    if Bp != B:
        x = jnp.pad(x, ((0, Bp - B), (0, 0)))
    grid = (Bp // tb,)

    # --- Per-variant kernel, operands, specs, cost estimate. ---
    l2_flops_term = (2 * H2) * (2 * H2) if not split_encoder_l2 else 2 * (H2 * H2)
    flops = 2 * Bp * (F * 2 * H2 + l2_flops_term + H2 * H + H * H)
    weight_elems = F * 2 * H2 + l2_flops_term + H2 * H + H * H
    bytes_accessed = (Bp * F * 2 + Bp * H * jnp.dtype(out_dtype).itemsize
                      + 2 * weight_elems + 4 * (4 * H2 + 2 * H))
    cost = pl.CostEstimate(flops=flops, transcendentals=0, bytes_accessed=bytes_accessed)

    const_spec = lambda shape: pl.BlockSpec(shape, lambda i: (0, 0))
    x_spec = pl.BlockSpec((tb, F), lambda i: (i, 0))
    out_spec = pl.BlockSpec((tb, H), lambda i: (i, 0))

    if split_encoder_l2:
        kernel = functools.partial(_kernel_split, act_dtype=act_dtype)
        wf2_b = wf2.astype(jnp.bfloat16)
        wg2_b = wg2.astype(jnp.bfloat16)
        bf2_r = bf2.reshape(1, H2).astype(jnp.float32)
        bg2_r = bg2.reshape(1, H2).astype(jnp.float32)
        operands = (x, w1_cat, b1_cat, wf2_b, bf2_r, wg2_b, bg2_r,
                    wd1_b, bd1_r, wd2_b, bd2_r)
        in_specs = [
            x_spec,
            const_spec((F, 2 * H2)), const_spec((1, 2 * H2)),
            const_spec((H2, H2)), const_spec((1, H2)),
            const_spec((H2, H2)), const_spec((1, H2)),
            const_spec((H2, H)), const_spec((1, H)),
            const_spec((H, H)), const_spec((1, H)),
        ]
    else:
        kernel = functools.partial(_kernel_fused, act_dtype=act_dtype)
        w2_cat = jnp.zeros((2 * H2, 2 * H2), jnp.float32)
        w2_cat = w2_cat.at[:H2, :H2].set(wf2)
        w2_cat = w2_cat.at[H2:, H2:].set(wg2)
        w2_cat = w2_cat.astype(jnp.bfloat16)
        b2_cat = jnp.concatenate([bf2, bg2]).reshape(1, 2 * H2).astype(jnp.float32)
        operands = (x, w1_cat, b1_cat, w2_cat, b2_cat, wd1_b, bd1_r, wd2_b, bd2_r)
        in_specs = [
            x_spec,
            const_spec((F, 2 * H2)), const_spec((1, 2 * H2)),
            const_spec((2 * H2, 2 * H2)), const_spec((1, 2 * H2)),
            const_spec((H2, H)), const_spec((1, H)),
            const_spec((H, H)), const_spec((1, H)),
        ]

    out = pl.pallas_call(
        kernel,
        out_shape=jax.ShapeDtypeStruct((Bp, H), out_dtype),
        grid_spec=pltpu.PrefetchScalarGridSpec(
            num_scalar_prefetch=0,
            grid=grid,
            in_specs=in_specs,
            out_specs=out_spec,
        ),
        compiler_params=pltpu.CompilerParams(
            dimension_semantics=("parallel",),
            vmem_limit_bytes=32 * 1024 * 1024,
        ),
        cost_estimate=cost,
    )(*operands)

    return out[:B] if Bp != B else out


# ----------------------------- reference --------------------------------------


def reference(x, params, *, n_form=16):
    """Pure-JAX reference matching the kernel's bf16-weights / f32-accumulate path."""
    def lin_relu(h, w, b):
        y = jnp.dot(h.astype(jnp.bfloat16), w.astype(jnp.bfloat16),
                    preferred_element_type=jnp.float32) + b
        return jnp.maximum(y, 0.0)

    wf1, bf1, wf2, bf2 = params["form"]
    wg1, bg1, wg2, bg2 = params["global"]
    wd1, bd1, wd2, bd2 = params["dense"]

    hf = lin_relu(lin_relu(x[:, :n_form], wf1, bf1), wf2, bf2)
    hg = lin_relu(lin_relu(x[:, n_form:], wg1, bg1), wg2, bg2)
    h = 0.5 * (hf + hg)
    h = lin_relu(h, wd1, bd1)
    return lin_relu(h, wd2, bd2)


def _init_linear(key, fan_in, fan_out):
    kw, kb = jax.random.split(key)
    bound = 1.0 / (fan_in ** 0.5)
    w = jax.random.uniform(kw, (fan_in, fan_out), jnp.float32, -bound, bound)
    b = jax.random.uniform(kb, (fan_out,), jnp.float32, -bound, bound)
    return w, b


if __name__ == "__main__":
    formula_dim = 21
    hidden_size = 256
    H2 = hidden_size // 2
    batch = 16

    key = jax.random.PRNGKey(0)
    kx, kf1, kf2, kg1, kg2, kd1, kd2 = jax.random.split(key, 7)

    x = jax.random.normal(kx, (batch, formula_dim), dtype=jnp.float32)

    wf1, bf1 = _init_linear(kf1, 16, H2)
    wf2, bf2 = _init_linear(kf2, H2, H2)
    wg1, bg1 = _init_linear(kg1, formula_dim - 16, H2)
    wg2, bg2 = _init_linear(kg2, H2, H2)
    wd1, bd1 = _init_linear(kd1, H2, hidden_size)
    wd2, bd2 = _init_linear(kd2, hidden_size, hidden_size)

    params = {
        "form": (wf1, bf1, wf2, bf2),
        "global": (wg1, bg1, wg2, bg2),
        "dense": (wd1, bd1, wd2, bd2),
    }

    ref = reference(x, params)

    # Auto-detected variant (fused on v6e/v7x, split on v5e and older).
    out = jax.block_until_ready(mlp_mean_agg_mlp(x, params))
    assert out.shape == (batch, hidden_size)
    assert jnp.allclose(out.astype(jnp.float32), ref, atol=3e-2, rtol=3e-2), \
        "mismatch vs reference (auto variant)"

    # Force both code paths so they are exercised regardless of the chip.
    out_fused = jax.block_until_ready(
        mlp_mean_agg_mlp(x, params, split_encoder_l2=False, bf16_intermediates=True))
    out_split = jax.block_until_ready(
        mlp_mean_agg_mlp(x, params, split_encoder_l2=True, bf16_intermediates=False))
    assert jnp.allclose(out_fused.astype(jnp.float32), ref, atol=3e-2, rtol=3e-2), \
        "mismatch vs reference (fused variant)"
    assert jnp.allclose(out_split.astype(jnp.float32), ref, atol=3e-2, rtol=3e-2), \
        "mismatch vs reference (split variant)"

    # Batch that is not a multiple of the tile granularity (pad + slice path).
    x13 = jax.random.normal(jax.random.PRNGKey(1), (13, formula_dim), dtype=jnp.float32)
    out13 = jax.block_until_ready(mlp_mean_agg_mlp(x13, params))
    ref13 = reference(x13, params)
    assert out13.shape == (13, hidden_size)
    assert jnp.allclose(out13.astype(jnp.float32), ref13, atol=3e-2, rtol=3e-2), \
        "mismatch vs reference (B=13)"

    # f32 output path still available for consumers that need it.
    out_f32 = jax.block_until_ready(mlp_mean_agg_mlp(x, params, out_dtype=jnp.float32))
    assert out_f32.dtype == jnp.float32
    assert jnp.allclose(out_f32, ref, atol=5e-3, rtol=5e-3), "mismatch vs reference (f32 out)"

    print("KERNEL_OK")
</pallas_src>

<mosaic_0001>
module attributes {stable_mosaic.version = 11 : i64} {
  func.func @_kernel_fused(%arg0: i32, %arg1: memref<16x21xbf16, #tpu.memory_space<vmem>>, %arg2: memref<21x256xbf16, #tpu.memory_space<vmem>>, %arg3: memref<1x256xf32, #tpu.memory_space<vmem>>, %arg4: memref<256x256xbf16, #tpu.memory_space<vmem>>, %arg5: memref<1x256xf32, #tpu.memory_space<vmem>>, %arg6: memref<128x256xbf16, #tpu.memory_space<vmem>>, %arg7: memref<1x256xf32, #tpu.memory_space<vmem>>, %arg8: memref<256x256xbf16, #tpu.memory_space<vmem>>, %arg9: memref<1x256xf32, #tpu.memory_space<vmem>>, %arg10: memref<16x256xbf16, #tpu.memory_space<vmem>>) attributes {dimension_semantics = [#tpu.dimension_semantics<parallel>], iteration_bounds = array<i64: 1>, scalar_prefetch = 0 : i64, scratch_operands = 0 : i64, tpu.core_type = #tpu.core_type<tc>, window_params = [{transform_indices = @transform_0, window_bounds = array<i64: 16, 21>}, {pipeline_mode = #tpu.pipeline_mode<synchronous>, transform_indices = @transform_1, window_bounds = array<i64: 21, 256>}, {pipeline_mode = #tpu.pipeline_mode<synchronous>, transform_indices = @transform_2, window_bounds = array<i64: 1, 256>}, {pipeline_mode = #tpu.pipeline_mode<synchronous>, transform_indices = @transform_3, window_bounds = array<i64: 256, 256>}, {pipeline_mode = #tpu.pipeline_mode<synchronous>, transform_indices = @transform_4, window_bounds = array<i64: 1, 256>}, {pipeline_mode = #tpu.pipeline_mode<synchronous>, transform_indices = @transform_5, window_bounds = array<i64: 128, 256>}, {pipeline_mode = #tpu.pipeline_mode<synchronous>, transform_indices = @transform_6, window_bounds = array<i64: 1, 256>}, {pipeline_mode = #tpu.pipeline_mode<synchronous>, transform_indices = @transform_7, window_bounds = array<i64: 256, 256>}, {pipeline_mode = #tpu.pipeline_mode<synchronous>, transform_indices = @transform_8, window_bounds = array<i64: 1, 256>}, {transform_indices = @transform_9, window_bounds = array<i64: 16, 256>}]} {
    %c0 = arith.constant 0 : index
    %c0_0 = arith.constant 0 : index
    %0 = vector.load %arg1[%c0, %c0_0] : memref<16x21xbf16, #tpu.memory_space<vmem>>, vector<16x21xbf16>
    %c0_1 = arith.constant 0 : index
    %c0_2 = arith.constant 0 : index
    %1 = vector.load %arg2[%c0_1, %c0_2] : memref<21x256xbf16, #tpu.memory_space<vmem>>, vector<21x256xbf16>
    %cst = arith.constant dense<0.000000e+00> : vector<16x256xf32>
    %2 = tpu.matmul %0, %1, %cst {dimension_numbers = #tpu.dot_dimension_numbers<[1], [0], [0], [1], [0, 0, 1, 1], [], []>} : vector<16x21xbf16>, vector<21x256xbf16>, vector<16x256xf32> -> vector<16x256xf32>
    %c0_3 = arith.constant 0 : index
    %c0_4 = arith.constant 0 : index
    %3 = vector.load %arg3[%c0_3, %c0_4] : memref<1x256xf32, #tpu.memory_space<vmem>>, vector<1x256xf32>
    %4 = vector.broadcast %3 : vector<1x256xf32> to vector<16x256xf32>
    %5 = arith.addf %2, %4 : vector<16x256xf32>
    %cst_5 = arith.constant 0.000000e+00 : f32
    %6 = vector.broadcast %cst_5 : f32 to vector<16x256xf32>
    %7 = arith.maximumf %5, %6 : vector<16x256xf32>
    %8 = arith.truncf %7 : vector<16x256xf32> to vector<16x256xbf16>
    %c0_6 = arith.constant 0 : index
    %c0_7 = arith.constant 0 : index
    %9 = vector.load %arg4[%c0_6, %c0_7] : memref<256x256xbf16, #tpu.memory_space<vmem>>, vector<256x256xbf16>
    %cst_8 = arith.constant dense<0.000000e+00> : vector<16x256xf32>
    %10 = tpu.matmul %8, %9, %cst_8 {dimension_numbers = #tpu.dot_dimension_numbers<[1], [0], [0], [1], [0, 0, 1, 1], [], []>} : vector<16x256xbf16>, vector<256x256xbf16>, vector<16x256xf32> -> vector<16x256xf32>
    %c0_9 = arith.constant 0 : index
    %c0_10 = arith.constant 0 : index
    %11 = vector.load %arg5[%c0_9, %c0_10] : memref<1x256xf32, #tpu.memory_space<vmem>>, vector<1x256xf32>
    %12 = vector.broadcast %11 : vector<1x256xf32> to vector<16x256xf32>
    %13 = arith.addf %10, %12 : vector<16x256xf32>
    %cst_11 = arith.constant 0.000000e+00 : f32
    %14 = vector.broadcast %cst_11 : f32 to vector<16x256xf32>
    %15 = arith.maximumf %13, %14 : vector<16x256xf32>
    %16 = vector.extract_strided_slice %15 {offsets = [0, 0], sizes = [16, 128], strides = [1, 1]} : vector<16x256xf32> to vector<16x128xf32>
    %17 = vector.extract_strided_slice %15 {offsets = [0, 128], sizes = [16, 128], strides = [1, 1]} : vector<16x256xf32> to vector<16x128xf32>
    %18 = arith.addf %16, %17 : vector<16x128xf32>
    %cst_12 = arith.constant 5.000000e-01 : f32
    %19 = vector.broadcast %cst_12 : f32 to vector<16x128xf32>
    %20 = arith.mulf %19, %18 : vector<16x128xf32>
    %21 = arith.truncf %20 : vector<16x128xf32> to vector<16x128xbf16>
    %c0_13 = arith.constant 0 : index
    %c0_14 = arith.constant 0 : index
    %22 = vector.load %arg6[%c0_13, %c0_14] : memref<128x256xbf16, #tpu.memory_space<vmem>>, vector<128x256xbf16>
    %cst_15 = arith.constant dense<0.000000e+00> : vector<16x256xf32>
    %23 = tpu.matmul %21, %22, %cst_15 {dimension_numbers = #tpu.dot_dimension_numbers<[1], [0], [0], [1], [0, 0, 1, 1], [], []>} : vector<16x128xbf16>, vector<128x256xbf16>, vector<16x256xf32> -> vector<16x256xf32>
    %c0_16 = arith.constant 0 : index
    %c0_17 = arith.constant 0 : index
    %24 = vector.load %arg7[%c0_16, %c0_17] : memref<1x256xf32, #tpu.memory_space<vmem>>, vector<1x256xf32>
    %25 = vector.broadcast %24 : vector<1x256xf32> to vector<16x256xf32>
    %26 = arith.addf %23, %25 : vector<16x256xf32>
    %cst_18 = arith.constant 0.000000e+00 : f32
    %27 = vector.broadcast %cst_18 : f32 to vector<16x256xf32>
    %28 = arith.maximumf %26, %27 : vector<16x256xf32>
    %29 = arith.truncf %28 : vector<16x256xf32> to vector<16x256xbf16>
    %c0_19 = arith.constant 0 : index
    %c0_20 = arith.constant 0 : index
    %30 = vector.load %arg8[%c0_19, %c0_20] : memref<256x256xbf16, #tpu.memory_space<vmem>>, vector<256x256xbf16>
    %cst_21 = arith.constant dense<0.000000e+00> : vector<16x256xf32>
    %31 = tpu.matmul %29, %30, %cst_21 {dimension_numbers = #tpu.dot_dimension_numbers<[1], [0], [0], [1], [0, 0, 1, 1], [], []>} : vector<16x256xbf16>, vector<256x256xbf16>, vector<16x256xf32> -> vector<16x256xf32>
    %c0_22 = arith.constant 0 : index
    %c0_23 = arith.constant 0 : index
    %32 = vector.load %arg9[%c0_22, %c0_23] : memref<1x256xf32, #tpu.memory_space<vmem>>, vector<1x256xf32>
    %33 = vector.broadcast %32 : vector<1x256xf32> to vector<16x256xf32>
    %34 = arith.addf %31, %33 : vector<16x256xf32>
    %cst_24 = arith.constant 0.000000e+00 : f32
    %35 = vector.broadcast %cst_24 : f32 to vector<16x256xf32>
    %36 = arith.maximumf %34, %35 : vector<16x256xf32>
    %37 = arith.truncf %36 : vector<16x256xf32> to vector<16x256xbf16>
    %c0_25 = arith.constant 0 : index
    %c0_26 = arith.constant 0 : index
    %38 = vector.load %arg10[%c0_25, %c0_26] : memref<16x256xbf16, #tpu.memory_space<vmem>>, vector<16x256xbf16>
    tpu.vector_store %arg10[%c0_25, %c0_26], %37 {strides = array<i32>} : memref<16x256xbf16, #tpu.memory_space<vmem>>, vector<16x256xbf16>,
    return
  }
  func.func @transform_0(%arg0: i32) -> (i32, i32) {
    %c0_i32 = arith.constant 0 : i32
    %c0_i32_0 = arith.constant 0 : i32
    return %arg0, %c0_i32 : i32, i32
  }
  func.func @transform_1(%arg0: i32) -> (i32, i32) {
    %c0_i32 = arith.constant 0 : i32
    %c0_i32_0 = arith.constant 0 : i32
    %c0_i32_1 = arith.constant 0 : i32
    return %c0_i32, %c0_i32_0 : i32, i32
  }
  func.func @transform_2(%arg0: i32) -> (i32, i32) {
    %c0_i32 = arith.constant 0 : i32
    %c0_i32_0 = arith.constant 0 : i32
    %c0_i32_1 = arith.constant 0 : i32
    return %c0_i32, %c0_i32_0 : i32, i32
  }
  func.func @transform_3(%arg0: i32) -> (i32, i32) {
    %c0_i32 = arith.constant 0 : i32
    %c0_i32_0 = arith.constant 0 : i32
    %c0_i32_1 = arith.constant 0 : i32
    return %c0_i32, %c0_i32_0 : i32, i32
  }
  func.func @transform_4(%arg0: i32) -> (i32, i32) {
    %c0_i32 = arith.constant 0 : i32
    %c0_i32_0 = arith.constant 0 : i32
    %c0_i32_1 = arith.constant 0 : i32
    return %c0_i32, %c0_i32_0 : i32, i32
  }
  func.func @transform_5(%arg0: i32) -> (i32, i32) {
    %c0_i32 = arith.constant 0 : i32
    %c0_i32_0 = arith.constant 0 : i32
    %c0_i32_1 = arith.constant 0 : i32
    return %c0_i32, %c0_i32_0 : i32, i32
  }
  func.func @transform_6(%arg0: i32) -> (i32, i32) {
    %c0_i32 = arith.constant 0 : i32
    %c0_i32_0 = arith.constant 0 : i32
    %c0_i32_1 = arith.constant 0 : i32
    return %c0_i32, %c0_i32_0 : i32, i32
  }
  func.func @transform_7(%arg0: i32) -> (i32, i32) {
    %c0_i32 = arith.constant 0 : i32
    %c0_i32_0 = arith.constant 0 : i32
    %c0_i32_1 = arith.constant 0 : i32
    return %c0_i32, %c0_i32_0 : i32, i32
  }
  func.func @transform_8(%arg0: i32) -> (i32, i32) {
    %c0_i32 = arith.constant 0 : i32
    %c0_i32_0 = arith.constant 0 : i32
    %c0_i32_1 = arith.constant 0 : i32
    return %c0_i32, %c0_i32_0 : i32, i32
  }
  func.func @transform_9(%arg0: i32) -> (i32, i32) {
    %c0_i32 = arith.constant 0 : i32
    %c0_i32_0 = arith.constant 0 : i32
    return %arg0, %c0_i32 : i32, i32
  }
}

</mosaic_0001>

<bundles_post_ra>
// kernel: tpu_custom_call.1
= control target key start
LH: loop header
LB: loop body
LE: loop exit
PB: predicated region body
PF: predicated region fallthrough
CT: control target
= control target key end

     0   :  { %14 = vsyncpa [#allocation3], 0  ;;  %s1440_s0 = inlined_call_operand.hbm [shape: bf16[16,21], index: 0, kind: input, shape index: {}]   ;;  %s1441_s1 = inlined_call_operand.hbm [shape: bf16[21,256], index: 1, kind: input, shape index: {}]   ;;  %s1442_s2 = inlined_call_operand.vmem [shape: f32[1,256], index: 2, kind: input, shape index: {}]   ;;  %s1443_s3 = inlined_call_operand.hbm [shape: bf16[256,256], index: 3, kind: input, shape index: {}]   ;;  %s1444_s4 = inlined_call_operand.vmem [shape: f32[1,256], index: 4, kind: input, shape index: {}]   ;;  %s1445_s5 = inlined_call_operand.hbm [shape: bf16[128,256], index: 5, kind: input, shape index: {}]   ;;  %s1446_s6 = inlined_call_operand.vmem [shape: f32[1,256], index: 6, kind: input, shape index: {}]   ;;  %s1447_s7 = inlined_call_operand.hbm [shape: bf16[256,256], index: 7, kind: input, shape index: {}]   ;;  %s1448_s8 = inlined_call_operand.vmem [shape: f32[1,256], index: 8, kind: input, shape index: {}]   ;;  %s1449_s9 = inlined_call_operand.hbm [shape: bf16[16,256], index: 9, kind: output, shape index: {}]  }
   0x1   :  { %15 = vsyncpa [#allocation6], 0 }
   0x2   :  { %16 = vsyncpa [#allocation9], 0 }
   0x3   :  { %17 = vsyncpa [#allocation4], 0  ;;  %s1267_s30 = smov [#allocation5]   ;;  %s1127_s13 = scalar_lea.hbm %s1441_s1, 384 }
   0x4   :  { %s35_s10 = sshll.u32 %s1267_s30, 4  ;;  %p1128_p0 = scmp.ne.s32.totalorder %s1441_s1, %s1127_s13  ;;  %s36_s10 = int_to_ptr.vmem [resolvable:$true] %s35_s10 }
   0x5   :  { %p1131_p1 = scmp.lt.u32.totalorder %s1127_s13, %s1441_s1 }
   0x7   :  { %p1133_p2 = pnand %p1131_p1, %p1128_p0 }
   0x9   :  { %1136 = shalt.err (!%p1133_p2)
}
   0xa   :  { %s1137_s18 = scalar_lea.vmem %s36_s10, 384  ;;  %p1142_p4 = scmp.lt.s32.totalorder %s36_s10, %s36_s10 }
   0xb   :  { %p1138_p3 = scmp.ne.s32.totalorder %s36_s10, %s1137_s18  ;;  %p1143_p5 = scmp.lt.s32.totalorder %s1137_s18, %s1137_s18 }
   0xd   :  { %p1144_p6 = por %p1143_p5, %p1142_p4 }
   0xf   :  { %p1145_p7 = pnand %p1144_p6, %p1138_p3 }
  0x11   :  { %1148 = shalt.err (!%p1145_p7)
}
  0x12   :  { %s1268_s19 = smov 128   ;;  %s1269_s20 = smov 8  }
  0x13   :  { %41 = dma.hbm_to_vmem [thread:$0]  %s1441_s1, 384, %s36_s10, [#allocation6], %s1268_s19, %s1268_s19, %s1269_s20  }
  0x14   :  { %s1270_s23 = smov [#allocation8]   ;;  %s1271_s25 = smov [#allocation2]  }
  0x15   :  { %s63_s24 = sshll.u32 %s1270_s23, 4  ;;  %s23_s26 = sshll.u32 %s1271_s25, 4  ;;  %s64_s24 = int_to_ptr.vmem [resolvable:$true] %s63_s24  ;;  %s24_s26 = int_to_ptr.vmem [resolvable:$true] %s23_s26 }
  0x16   :  { %s1149_s29 = scalar_lea.hbm %s1445_s5, 2048 }
  0x17   :  { %p1150_p8 = scmp.ne.s32.totalorder %s1445_s5, %s1149_s29  ;;  %p1153_p9 = scmp.lt.u32.totalorder %s1149_s29, %s1445_s5 }
  0x19   :  { %p1155_p10 = pnand %p1153_p9, %p1150_p8 }
  0x1b   :  { %1158 = shalt.err (!%p1155_p10)
}
  0x1c   :  { %s1159_s1 = scalar_lea.vmem %s64_s24, 2048  ;;  %p1164_p12 = scmp.lt.s32.totalorder %s64_s24, %s64_s24 }
  0x1d   :  { %p1160_p11 = scmp.ne.s32.totalorder %s64_s24, %s1159_s1  ;;  %p1165_p13 = scmp.lt.s32.totalorder %s1159_s1, %s1159_s1 }
  0x1f   :  { %p1166_p0 = por %p1165_p13, %p1164_p12 }
  0x21   :  { %p1167_p1 = pnand %p1166_p0, %p1160_p11 }
  0x23   :  { %1170 = shalt.err (!%p1167_p1)
}
  0x24   :  { %69 = dma.hbm_to_vmem [thread:$0]  %s1445_s5, 2048, %s64_s24, [#allocation9], %s1268_s19, %s1268_s19, %s1269_s20  }
  0x25   :  { %s1171_s17 = scalar_lea.hbm %s1440_s0, 128 }
  0x26   :  { %p1172_p2 = scmp.ne.s32.totalorder %s1440_s0, %s1171_s17  ;;  %p1175_p3 = scmp.lt.u32.totalorder %s1171_s17, %s1440_s0 }
  0x28   :  { %p1177_p4 = pnand %p1175_p3, %p1172_p2 }
  0x2a   :  { %1180 = shalt.err (!%p1177_p4)
}
  0x2b   :  { %s1181_s25 = scalar_lea.vmem %s24_s26, 128  ;;  %p1186_p6 = scmp.lt.s32.totalorder %s24_s26, %s24_s26 }
  0x2c   :  { %p1182_p5 = scmp.ne.s32.totalorder %s24_s26, %s1181_s25  ;;  %p1187_p7 = scmp.lt.s32.totalorder %s1181_s25, %s1181_s25 }
  0x2e   :  { %p1188_p8 = por %p1187_p7, %p1186_p6 }
  0x30   :  { %p1189_p9 = pnand %p1188_p8, %p1182_p5 }
  0x32   :  { %1192 = shalt.err (!%p1189_p9)
}
  0x33   :  { %s1272_s5 = smov 64   ;;  %s1273_s24 = smov 4  }
  0x34   :  { %29 = dma.hbm_to_vmem [thread:$0]  %s1440_s0, 128, %s24_s26, [#allocation3], %s1272_s5, %s1272_s5, %s1273_s24  }
  0x35   :  { %s1274_s29 = smov [#allocation7]   ;;  %s1275_s11 = smov [#allocation10]  }
  0x36   :  { %s49_s30 = sshll.u32 %s1274_s29, 4  ;;  %s77_s12 = sshll.u32 %s1275_s11, 4  ;;  %s50_s30 = int_to_ptr.vmem [resolvable:$true] %s49_s30  ;;  %s78_s12 = int_to_ptr.vmem [resolvable:$true] %s77_s12 }
  0x37   :  { %s1193_s10 = scalar_lea.hbm %s1443_s3, 4096 }
  0x38   :  { %p1194_p10 = scmp.ne.s32.totalorder %s1443_s3, %s1193_s10  ;;  %p1197_p11 = scmp.lt.u32.totalorder %s1193_s10, %s1443_s3 }
  0x3a   :  { %p1199_p12 = pnand %p1197_p11, %p1194_p10 }
  0x3c   :  { %1202 = shalt.err (!%p1199_p12)
}
  0x3d   :  { %s1203_s0 = scalar_lea.vmem %s50_s30, 4096  ;;  %p1208_p0 = scmp.lt.s32.totalorder %s50_s30, %s50_s30 }
  0x3e   :  { %p1204_p13 = scmp.ne.s32.totalorder %s50_s30, %s1203_s0  ;;  %p1209_p1 = scmp.lt.s32.totalorder %s1203_s0, %s1203_s0 }
  0x40   :  { %p1210_p2 = por %p1209_p1, %p1208_p0 }
  0x42   :  { %p1211_p3 = pnand %p1210_p2, %p1204_p13 }
  0x44   :  { %1214 = shalt.err (!%p1211_p3)
}
  0x45   :  { %55 = dma.hbm_to_vmem [thread:$0]  %s1443_s3, 4096, %s50_s30, [#allocation6], %s1268_s19, %s1268_s19, %s1269_s20  }
  0x46   :  { %s1215_s23 = scalar_lea.hbm %s1447_s7, 4096 }
  0x47   :  { %p1216_p4 = scmp.ne.s32.totalorder %s1447_s7, %s1215_s23  ;;  %p1219_p5 = scmp.lt.u32.totalorder %s1215_s23, %s1447_s7 }
  0x49   :  { %p1221_p6 = pnand %p1219_p5, %p1216_p4 }
  0x4b   :  { %1224 = shalt.err (!%p1221_p6)
}
  0x4c   :  { %s1225_s28 = scalar_lea.vmem %s78_s12, 4096  ;;  %p1230_p8 = scmp.lt.s32.totalorder %s78_s12, %s78_s12 }
  0x4d   :  { %p1226_p7 = scmp.ne.s32.totalorder %s78_s12, %s1225_s28  ;;  %p1231_p9 = scmp.lt.s32.totalorder %s1225_s28, %s1225_s28 }
  0x4f   :  { %p1232_p10 = por %p1231_p9, %p1230_p8 }
  0x51   :  { %p1233_p11 = pnand %p1232_p10, %p1226_p7 }
  0x53   :  { %1236 = shalt.err (!%p1233_p11)
}
  0x54   :  { %83 = dma.hbm_to_vmem [thread:$0]  %s1447_s7, 4096, %s78_s12, [#allocation9], %s1268_s19, %s1268_s19, %s1269_s20  }
  0x55   :  { %1259 = dma.done.wait [#allocation3], 128  }
  0x56   :  { %1260 = vsyncadd [#allocation3], 4294967168 }
  0x57   :  { %1261 = dma.done.wait [#allocation6], 4480  }
  0x58   :  { %1262 = vsyncadd [#allocation6], 4294962816 }
  0x59   :  { %1263 = dma.done.wait [#allocation9], 6144  }
  0x5a   :  { %1264 = vsyncadd [#allocation9], 4294961152  ;;  %vm143_vm0 = vcmask 1041408   ;;  %v1276_v0 = vmov 0   ;;  %vm144_vm1 = vcmask 1042432   ;;  %v1277_v1 = vmov 65535  }
  0x5b   :  { %185 = vmatprep.mubr.bf16.mxu1 %v1276_v0  ;;  %598 = vmatprep.mubr.bf16.mxu0 %v1276_v0  ;;  %v145_v2 = vsel %vm143_vm0, 4294967295, %v1277_v1  ;;  %v1001_v3 = vld [vmem:[#allocation5 + $0x4] ss:$8 sps:$4 sm:$0xff]   ;;  %v1003_v5 = vld [vmem:[#allocation5] ss:$8 sps:$4 sm:$0xff]   ;;  %v1006_v12 = vld [vmem:[#allocation2] sm:$0xff]   ;;  %v109_v54 = vlaneseq }
  0x5c   :  { %v146_v4 = vsel %vm144_vm1, %v145_v2, 0  ;;  %v106_v6 = vld [vmem:[#allocation5 + $0x10] sm:$0x77]  ;;  %153 = vmatprep.subr.bf16.mxu1 %v1001_v3  ;;  %v1009_v11 = vld [vmem:[#allocation7 + $0x4] ss:$8 sps:$4 sm:$0xff]   ;;  %vm139_vm2 = vcmask 171008  }
  0x5d   :  { %v903_v7 = vcombine.high %v106_v6, %v106_v6  ;;  %v902_v8 = vcombine.low %v106_v6, %v106_v6  ;;  %154 = vmatpush1.bf16.msra.mxu1 %v1003_v5  ;;  %v1007_v13 = vld [vmem:[#allocation7] ss:$8 sps:$4 sm:$0xff]   ;;  %v1012_v14 = vld [vmem:[#allocation7 + $0x14] ss:$8 sps:$4 sm:$0xff]   ;;  %v1010_v15 = vld [vmem:[#allocation7 + $0x10] ss:$8 sps:$4 sm:$0xff]  }
  0x5e   :  { %v1015_v16 = vld [vmem:[#allocation7 + $0x24] ss:$8 sps:$4 sm:$0xff]   ;;  %v1013_v17 = vld [vmem:[#allocation7 + $0x20] ss:$8 sps:$4 sm:$0xff]   ;;  %v1018_v18 = vld [vmem:[#allocation7 + $0x34] ss:$8 sps:$4 sm:$0xff]  }
  0x5f   :  { %v151_v9 = vand.u32 %v903_v7, %v146_v4  ;;  %v148_v10 = vand.u32 %v902_v8, %v146_v4  ;;  %v1016_v19 = vld [vmem:[#allocation7 + $0x30] ss:$8 sps:$4 sm:$0xff]   ;;  %v1021_v20 = vld [vmem:[#allocation7 + $0x44] ss:$8 sps:$4 sm:$0xff]   ;;  %v1019_v21 = vld [vmem:[#allocation7 + $0x40] ss:$8 sps:$4 sm:$0xff]  }
  0x60   :  { %v1024_v22 = vld [vmem:[#allocation7 + $0x54] ss:$8 sps:$4 sm:$0xff]   ;;  %v1022_v23 = vld [vmem:[#allocation7 + $0x50] ss:$8 sps:$4 sm:$0xff]   ;;  %v1027_v24 = vld [vmem:[#allocation7 + $0x64] ss:$8 sps:$4 sm:$0xff]  }
  0x61   :  { %155 = vmatprep.subr.bf16.mxu1 %v151_v9  ;;  %v1025_v25 = vld [vmem:[#allocation7 + $0x60] ss:$8 sps:$4 sm:$0xff]   ;;  %v1030_v26 = vld [vmem:[#allocation7 + $0x74] ss:$8 sps:$4 sm:$0xff]   ;;  %v1028_v27 = vld [vmem:[#allocation7 + $0x70] ss:$8 sps:$4 sm:$0xff]  }
  0x62   :  { %156 = vmatpush1.bf16.msra.mxu1 %v148_v10  ;;  %v1033_v28 = vld [vmem:[#allocation7 + $0x84] ss:$8 sps:$4 sm:$0xff]   ;;  %v1031_v29 = vld [vmem:[#allocation7 + $0x80] ss:$8 sps:$4 sm:$0xff]   ;;  %v1036_v30 = vld [vmem:[#allocation7 + $0x94] ss:$8 sps:$4 sm:$0xff]  }
  0x63   :  { %406 = vmatprep.subr.bf16.mxu1 %v1009_v11  ;;  %v1034_v31 = vld [vmem:[#allocation7 + $0x90] ss:$8 sps:$4 sm:$0xff]   ;;  %v1039_v32 = vld [vmem:[#allocation7 + $0xa4] ss:$8 sps:$4 sm:$0xff]   ;;  %v1037_v33 = vld [vmem:[#allocation7 + $0xa0] ss:$8 sps:$4 sm:$0xff]  }
  0x64   :  { %v1042_v34 = vld [vmem:[#allocation7 + $0xb4] ss:$8 sps:$4 sm:$0xff]   ;;  %v1040_v35 = vld [vmem:[#allocation7 + $0xb0] ss:$8 sps:$4 sm:$0xff]   ;;  %v1045_v36 = vld [vmem:[#allocation7 + $0xc4] ss:$8 sps:$4 sm:$0xff]  }
  0x65   :  { %904 = vmatmul.mubr.msk.bf16.vlgmr.msra.gmra.mrb[0].mxu1 %vm139_vm2, %v1006_v12  ;;  %v1043_v37 = vld [vmem:[#allocation7 + $0xc0] ss:$8 sps:$4 sm:$0xff]   ;;  %v1048_v38 = vld [vmem:[#allocation7 + $0xd4] ss:$8 sps:$4 sm:$0xff]   ;;  %v1046_v39 = vld [vmem:[#allocation7 + $0xd0] ss:$8 sps:$4 sm:$0xff]  }
  0x66   :  { %407 = vmatpush1.bf16.msra.mxu1 %v1007_v13  ;;  %v1051_v40 = vld [vmem:[#allocation7 + $0xe4] ss:$8 sps:$4 sm:$0xff]   ;;  %v1049_v41 = vld [vmem:[#allocation7 + $0xe0] ss:$8 sps:$4 sm:$0xff]   ;;  %v1054_v42 = vld [vmem:[#allocation7 + $0xf4] ss:$8 sps:$4 sm:$0xff]  }
  0x67   :  { %408 = vmatprep.subr.bf16.mxu1 %v1012_v14  ;;  %v1052_v43 = vld [vmem:[#allocation7 + $0xf0] ss:$8 sps:$4 sm:$0xff]   ;;  %v1055_v44 = vld [vmem:[#allocation8 + $0x4] ss:$8 sps:$4 sm:$0xff]   ;;  %v1057_v45 = vld [vmem:[#allocation8] ss:$8 sps:$4 sm:$0xff]  }
  0x68   :  { %v1058_v46 = vld [vmem:[#allocation8 + $0x14] ss:$8 sps:$4 sm:$0xff]   ;;  %566 = vmatprep.subr.bf16.mxu0 %v1055_v44  ;;  %v1060_v47 = vld [vmem:[#allocation8 + $0x10] ss:$8 sps:$4 sm:$0xff]   ;;  %v1061_v48 = vld [vmem:[#allocation8 + $0x24] ss:$8 sps:$4 sm:$0xff]  }
  0x69   :  { %567 = vmatpush1.bf16.msra.mxu0 %v1057_v45  ;;  %v1063_v49 = vld [vmem:[#allocation8 + $0x20] ss:$8 sps:$4 sm:$0xff]   ;;  %v1064_v50 = vld [vmem:[#allocation8 + $0x34] ss:$8 sps:$4 sm:$0xff]   ;;  %v1066_v51 = vld [vmem:[#allocation8 + $0x30] ss:$8 sps:$4 sm:$0xff]  }
  0x6a   :  { %409 = vmatpush1.bf16.msra.mxu1 %v1010_v15  ;;  %568 = vmatprep.subr.bf16.mxu0 %v1058_v46  ;;  %v1067_v52 = vld [vmem:[#allocation8 + $0x44] ss:$8 sps:$4 sm:$0xff]   ;;  %v1069_v53 = vld [vmem:[#allocation8 + $0x40] ss:$8 sps:$4 sm:$0xff]   ;;  %v110_v55 = vshrl.u32 %v109_v54, 7  ;;  %s1278_s1 = smov [#allocation11]  }
  0x6b   :  { %410 = vmatprep.subr.bf16.mxu1 %v1015_v16  ;;  %v107_v57 = vld [vmem:[%s1442_s2] sm:$0x3]  ;;  %v1070_v11 = vld [vmem:[#allocation8 + $0x54] ss:$8 sps:$4 sm:$0xff]   ;;  %v1072_v12 = vld [vmem:[#allocation8 + $0x50] ss:$8 sps:$4 sm:$0xff]  }
  0x6c   :  { %v1401_v56 = vsub.s32 0, %v110_v55  ;;  %v1406_v58 = vsub.s32 1, %v110_v55  ;;  %v1073_v13 = vld [vmem:[#allocation8 + $0x64] ss:$8 sps:$4 sm:$0xff]   ;;  %v1075_v14 = vld [vmem:[#allocation8 + $0x60] ss:$8 sps:$4 sm:$0xff]  }
  0x6d   :  { %569 = vmatpush1.bf16.msra.mxu0 %v1060_v47  ;;  %v1076_v15 = vld [vmem:[#allocation8 + $0x74] ss:$8 sps:$4 sm:$0xff]   ;;  %v1078_v16 = vld [vmem:[#allocation8 + $0x70] ss:$8 sps:$4 sm:$0xff]   ;;  %v1093_v45 = vld [vmem:[#allocation10 + $0x44] ss:$8 sps:$4 sm:$0xff]  }
  0x6e   :  { %411 = vmatpush1.bf16.msra.mxu1 %v1013_v17  ;;  %570 = vmatprep.subr.bf16.mxu0 %v1061_v48  ;;  %v112_v59 = vrot.slane %v107_v57, %v1401_v56  ;;  %v116_v60 = vrot.slane %v107_v57, %v1406_v58  ;;  %v1081_v17 = vld [vmem:[#allocation10 + $0x4] ss:$8 sps:$4 sm:$0xff]   ;;  %v1088_v44 = vld [vmem:[#allocation10 + $0x30] ss:$8 sps:$4 sm:$0xff]   ;;  %v1091_v46 = vld [vmem:[#allocation10 + $0x40] ss:$8 sps:$4 sm:$0xff]  }
  0x6f   :  { %412 = vmatprep.subr.bf16.mxu1 %v1018_v18  ;;  %v234_v18 = vld [vmem:[%s1444_s4] sm:$0x3]  ;;  %v1096_v47 = vld [vmem:[#allocation10 + $0x54] ss:$8 sps:$4 sm:$0xff]   ;;  %v1094_v48 = vld [vmem:[#allocation10 + $0x50] ss:$8 sps:$4 sm:$0xff]  }
  0x70   :  { %v1103_v54 = vld [vmem:[#allocation10 + $0x80] ss:$8 sps:$4 sm:$0xff]   ;;  %v1108_v55 = vld [vmem:[#allocation10 + $0x94] ss:$8 sps:$4 sm:$0xff]   ;;  %v1106_v57 = vld [vmem:[#allocation10 + $0x90] ss:$8 sps:$4 sm:$0xff]  }
  0x71   :  { %571 = vmatpush1.bf16.msra.mxu0 %v1063_v49  ;;  %v1099_v49 = vld [vmem:[#allocation10 + $0x64] ss:$8 sps:$4 sm:$0xff]   ;;  %s885_s10 = sshll.u32 %s1278_s1, 4  ;;  %s886_s10 = int_to_ptr.vmem [resolvable:$true] %s885_s10 }
  0x72   :  { %413 = vmatpush1.bf16.msra.mxu1 %v1016_v19  ;;  %572 = vmatprep.subr.bf16.mxu0 %v1064_v50  ;;  %v239_v19 = vrot.slane %v234_v18, %v1401_v56  ;;  %v1097_v50 = vld [vmem:[#allocation10 + $0x60] ss:$8 sps:$4 sm:$0xff]   ;;  %p1242_p13 = scmp.lt.s32.totalorder %s886_s10, %s886_s10 }
  0x73   :  { %414 = vmatprep.subr.bf16.mxu1 %v1021_v20  ;;  %v243_v20 = vrot.slane %v234_v18, %v1406_v58 }
  0x75   :  { %573 = vmatpush1.bf16.msra.mxu0 %v1066_v51  ;;  %v1102_v51 = vld [vmem:[#allocation10 + $0x74] ss:$8 sps:$4 sm:$0xff]  }
  0x76   :  { %415 = vmatpush1.bf16.msra.mxu1 %v1019_v21  ;;  %574 = vmatprep.subr.bf16.mxu0 %v1067_v52  ;;  %v1100_v52 = vld [vmem:[#allocation10 + $0x70] ss:$8 sps:$4 sm:$0xff]  }
  0x77   :  { %416 = vmatprep.subr.bf16.mxu1 %v1024_v22 }
  0x79   :  { %575 = vmatpush1.bf16.msra.mxu0 %v1069_v53  ;;  %v1105_v53 = vld [vmem:[#allocation10 + $0x84] ss:$8 sps:$4 sm:$0xff]  }
  0x7a   :  { %417 = vmatpush1.bf16.msra.mxu1 %v1022_v23  ;;  %576 = vmatprep.subr.bf16.mxu0 %v1070_v11 }
  0x7b   :  { %418 = vmatprep.subr.bf16.mxu1 %v1027_v24 }
  0x7d   :  { %577 = vmatpush1.bf16.msra.mxu0 %v1072_v12 }
  0x7e   :  { %419 = vmatpush1.bf16.msra.mxu1 %v1025_v25  ;;  %578 = vmatprep.subr.bf16.mxu0 %v1073_v13 }
  0x7f   :  { %420 = vmatprep.subr.bf16.mxu1 %v1030_v26 }
  0x81   :  { %579 = vmatpush1.bf16.msra.mxu0 %v1075_v14 }
  0x82   :  { %421 = vmatpush1.bf16.msra.mxu1 %v1028_v27  ;;  %580 = vmatprep.subr.bf16.mxu0 %v1076_v15 }
  0x83   :  { %422 = vmatprep.subr.bf16.mxu1 %v1033_v28 }
  0x85   :  { %581 = vmatpush1.bf16.msra.mxu0 %v1078_v16 }
  0x86   :  { %423 = vmatpush1.bf16.msra.mxu1 %v1031_v29  ;;  %819 = vmatprep.subr.bf16.mxu0 %v1081_v17 }
  0x87   :  { %424 = vmatprep.subr.bf16.mxu1 %v1036_v30 }
  0x8a   :  { %425 = vmatpush1.bf16.msra.mxu1 %v1034_v31 }
  0x8b   :  { %426 = vmatprep.subr.bf16.mxu1 %v1039_v32 }
  0x8e   :  { %427 = vmatpush1.bf16.msra.mxu1 %v1037_v33 }
  0x8f   :  { %428 = vmatprep.subr.bf16.mxu1 %v1042_v34 }
  0x92   :  { %429 = vmatpush1.bf16.msra.mxu1 %v1040_v35 }
  0x93   :  { %430 = vmatprep.subr.bf16.mxu1 %v1045_v36 }
  0x96   :  { %431 = vmatpush1.bf16.msra.mxu1 %v1043_v37  ;;  %v1079_v37 = vld [vmem:[#allocation10] ss:$8 sps:$4 sm:$0xff]  }
  0x97   :  { %432 = vmatprep.subr.bf16.mxu1 %v1048_v38 }
  0x9a   :  { %433 = vmatpush1.bf16.msra.mxu1 %v1046_v39  ;;  %v1084_v39 = vld [vmem:[#allocation10 + $0x14] ss:$8 sps:$4 sm:$0xff]  }
  0x9b   :  { %434 = vmatprep.subr.bf16.mxu1 %v1051_v40  ;;  %v1082_v40 = vld [vmem:[#allocation10 + $0x10] ss:$8 sps:$4 sm:$0xff]  }
  0x9e   :  { %435 = vmatpush1.bf16.msra.mxu1 %v1049_v41  ;;  %v1087_v41 = vld [vmem:[#allocation10 + $0x24] ss:$8 sps:$4 sm:$0xff]  }
  0x9f   :  { %436 = vmatprep.subr.bf16.mxu1 %v1054_v42  ;;  %v1085_v42 = vld [vmem:[#allocation10 + $0x20] ss:$8 sps:$4 sm:$0xff]  }
  0xa2   :  { %437 = vmatpush1.bf16.msra.mxu1 %v1052_v43  ;;  %v1090_v43 = vld [vmem:[#allocation10 + $0x34] ss:$8 sps:$4 sm:$0xff]  }
 0x138   :  { %v187_v61 = vpop.f32.mrb[0].mxu1 }
 0x139   :  { %v188_v62 = vadd.f32 %v187_v61, %v112_v59  ;;  %v189_v63 = vpop.f32.mrb[1].mxu1  ;;  %v1114_v61 = vld [vmem:[#allocation10 + $0xb4] ss:$8 sps:$4 sm:$0xff]  }
 0x13a   :  { %v190_v0 = vadd.f32 %v189_v63, %v116_v60  ;;  %v191_v1 = vpop.f32.mrb[2].mxu1  ;;  %v1117_v63 = vld [vmem:[#allocation10 + $0xc4] ss:$8 sps:$4 sm:$0xff]  }
 0x13b   :  { %v192_v2 = vadd.f32 %v191_v1, %v112_v59  ;;  %v193_v3 = vpop.f32.mrb[3].mxu1  ;;  %v196_v5 = vmax.f32 %v188_v62, 0.0  ;;  %v1111_v59 = vld [vmem:[#allocation10 + $0xa4] ss:$8 sps:$4 sm:$0xff]   ;;  %v1112_v62 = vld [vmem:[#allocation10 + $0xb0] ss:$8 sps:$4 sm:$0xff]  }
 0x13c   :  { %v194_v4 = vadd.f32 %v193_v3, %v116_v60  ;;  %v197_v7 = vmax.f32 %v190_v0, 0.0  ;;  %v1109_v60 = vld [vmem:[#allocation10 + $0xa0] ss:$8 sps:$4 sm:$0xff]   ;;  %v1120_v1 = vld [vmem:[#allocation10 + $0xd4] ss:$8 sps:$4 sm:$0xff]  }
 0x13d   :  { %v198_v6 = vmax.f32 %v192_v2, 0.0  ;;  %v1115_v0 = vld [vmem:[#allocation10 + $0xc0] ss:$8 sps:$4 sm:$0xff]   ;;  %v1118_v2 = vld [vmem:[#allocation10 + $0xd0] ss:$8 sps:$4 sm:$0xff]  }
 0x13e   :  { %v199_v8 = vmax.f32 %v194_v4, 0.0  ;;  %v1123_v3 = vld [vmem:[#allocation10 + $0xe4] ss:$8 sps:$4 sm:$0xff]   ;;  %v1121_v4 = vld [vmem:[#allocation10 + $0xe0] ss:$8 sps:$4 sm:$0xff]  }
 0x13f   :  { %v200_v9 = vpack.c.bf16 %v198_v6, %v196_v5  ;;  %v1126_v5 = vld [vmem:[#allocation10 + $0xf4] ss:$8 sps:$4 sm:$0xff]   ;;  %v1124_v6 = vld [vmem:[#allocation10 + $0xf0] ss:$8 sps:$4 sm:$0xff]  }
 0x140   :  { %v201_v10 = vpack.c.bf16 %v199_v8, %v197_v7  ;;  %v474_v7 = vld [vmem:[%s1446_s6] sm:$0x3] }
 0x141   :  { %v479_v8 = vrot.slane %v474_v7, %v1401_v56 }
 0x142   :  { %438 = vmatprep.mubr.bf16.mxu1 %v201_v10 }
 0x143   :  { %439 = vmatmul.mubr.bf16.vlgmr.msra.gmra.mrb[4].mxu1 %v200_v9  ;;  %v483_v9 = vrot.slane %v474_v7, %v1406_v58 }
 0x216   :  { %v440_v21 = vpop.f32.mrb[4].mxu1 }
 0x217   :  { %v441_v22 = vadd.f32 %v440_v21, %v239_v19  ;;  %v442_v23 = vpop.f32.mrb[5].mxu1 }
 0x218   :  { %v443_v24 = vadd.f32 %v442_v23, %v243_v20  ;;  %v444_v25 = vpop.f32.mrb[6].mxu1 }
 0x219   :  { %v449_v26 = vmax.f32 %v441_v22, 0.0  ;;  %v445_v27 = vadd.f32 %v444_v25, %v239_v19  ;;  %v446_v28 = vpop.f32.mrb[7].mxu1 }
 0x21a   :  { %v450_v29 = vmax.f32 %v443_v24, 0.0  ;;  %v447_v30 = vadd.f32 %v446_v28, %v243_v20  ;;  %v647_v24 = vld [vmem:[%s1448_s8] sm:$0x3]  ;;  %s1237_s8 = scalar_lea.vmem %s886_s10, 256 }
 0x21b   :  { %v451_v31 = vmax.f32 %v445_v27, 0.0  ;;  %v652_v25 = vrot.slane %v647_v24, %v1401_v56  ;;  %p1238_p12 = scmp.ne.s32.totalorder %s886_s10, %s1237_s8  ;;  %p1243_p0 = scmp.lt.s32.totalorder %s1237_s8, %s1237_s8 }
 0x21c   :  { %v453_v32 = vadd.f32 %v450_v29, %v449_v26  ;;  %v452_v33 = vmax.f32 %v447_v30, 0.0  ;;  %v656_v26 = vrot.slane %v647_v24, %v1406_v58 }
 0x21d   :  { %p1244_p1 = por %p1243_p0, %p1242_p13 }
 0x21e   :  { %v454_v34 = vadd.f32 %v452_v33, %v451_v31  ;;  %v455_v35 = vmul.f32 0.5, %v453_v32 }
 0x21f   :  { %p1245_p2 = pnand %p1244_p1, %p1238_p12 }
 0x220   :  { %v456_v36 = vmul.f32 0.5, %v454_v34 }
 0x222   :  { %v457_v38 = vpack.c.bf16 %v456_v36, %v455_v35 }
 0x224   :  { %599 = vmatmul.mubr.bf16.vlgmr.msra.gmra.mrb[0].mxu0 %v457_v38 }
 0x225   :  { %820 = vmatpush1.bf16.msra.mxu0 %v1079_v37 }
 0x226   :  { %821 = vmatprep.subr.bf16.mxu0 %v1084_v39 }
 0x229   :  { %822 = vmatpush1.bf16.msra.mxu0 %v1082_v40 }
 0x22a   :  { %823 = vmatprep.subr.bf16.mxu0 %v1087_v41 }
 0x22d   :  { %824 = vmatpush1.bf16.msra.mxu0 %v1085_v42 }
 0x22e   :  { %825 = vmatprep.subr.bf16.mxu0 %v1090_v43 }
 0x231   :  { %826 = vmatpush1.bf16.msra.mxu0 %v1088_v44 }
 0x232   :  { %827 = vmatprep.subr.bf16.mxu0 %v1093_v45 }
 0x235   :  { %828 = vmatpush1.bf16.msra.mxu0 %v1091_v46 }
 0x236   :  { %829 = vmatprep.subr.bf16.mxu0 %v1096_v47 }
 0x239   :  { %830 = vmatpush1.bf16.msra.mxu0 %v1094_v48 }
 0x23a   :  { %831 = vmatprep.subr.bf16.mxu0 %v1099_v49 }
 0x23d   :  { %832 = vmatpush1.bf16.msra.mxu0 %v1097_v50 }
 0x23e   :  { %833 = vmatprep.subr.bf16.mxu0 %v1102_v51 }
 0x241   :  { %834 = vmatpush1.bf16.msra.mxu0 %v1100_v52 }
 0x242   :  { %835 = vmatprep.subr.bf16.mxu0 %v1105_v53 }
 0x245   :  { %836 = vmatpush1.bf16.msra.mxu0 %v1103_v54 }
 0x246   :  { %837 = vmatprep.subr.bf16.mxu0 %v1108_v55 }
 0x249   :  { %838 = vmatpush1.bf16.msra.mxu0 %v1106_v57 }
 0x24a   :  { %839 = vmatprep.subr.bf16.mxu0 %v1111_v59 }
 0x24d   :  { %840 = vmatpush1.bf16.msra.mxu0 %v1109_v60 }
 0x24e   :  { %841 = vmatprep.subr.bf16.mxu0 %v1114_v61 }
 0x251   :  { %842 = vmatpush1.bf16.msra.mxu0 %v1112_v62 }
 0x252   :  { %843 = vmatprep.subr.bf16.mxu0 %v1117_v63 }
 0x255   :  { %844 = vmatpush1.bf16.msra.mxu0 %v1115_v0 }
 0x256   :  { %845 = vmatprep.subr.bf16.mxu0 %v1120_v1 }
 0x259   :  { %846 = vmatpush1.bf16.msra.mxu0 %v1118_v2 }
 0x25a   :  { %847 = vmatprep.subr.bf16.mxu0 %v1123_v3 }
 0x25d   :  { %848 = vmatpush1.bf16.msra.mxu0 %v1121_v4 }
 0x25e   :  { %849 = vmatprep.subr.bf16.mxu0 %v1126_v5 }
 0x261   :  { %850 = vmatpush1.bf16.msra.mxu0 %v1124_v6 }
 0x2f7   :  { %v600_v10 = vpop.f32.mrb[0].mxu0 }
 0x2f8   :  { %v601_v11 = vadd.f32 %v600_v10, %v479_v8  ;;  %v602_v12 = vpop.f32.mrb[1].mxu0 }
 0x2f9   :  { %v603_v13 = vadd.f32 %v602_v12, %v483_v9  ;;  %v604_v14 = vpop.f32.mrb[2].mxu0 }
 0x2fa   :  { %v605_v15 = vadd.f32 %v604_v14, %v479_v8  ;;  %v606_v16 = vpop.f32.mrb[3].mxu0  ;;  %v609_v18 = vmax.f32 %v601_v11, 0.0 }
 0x2fb   :  { %v607_v17 = vadd.f32 %v606_v16, %v483_v9  ;;  %v610_v20 = vmax.f32 %v603_v13, 0.0 }
 0x2fc   :  { %v611_v19 = vmax.f32 %v605_v15, 0.0 }
 0x2fd   :  { %v612_v21 = vmax.f32 %v607_v17, 0.0 }
 0x2fe   :  { %v613_v22 = vpack.c.bf16 %v611_v19, %v609_v18 }
 0x2ff   :  { %v614_v23 = vpack.c.bf16 %v612_v21, %v610_v20 }
 0x301   :  { %851 = vmatprep.mubr.bf16.mxu0 %v614_v23 }
 0x302   :  { %852 = vmatmul.mubr.bf16.vlgmr.msra.gmra.mrb[4].mxu0 %v613_v22 }
 0x3d5   :  { %v853_v27 = vpop.f32.mrb[4].mxu0 }
 0x3d6   :  { %v854_v28 = vadd.f32 %v853_v27, %v652_v25  ;;  %v855_v29 = vpop.f32.mrb[5].mxu0 }
 0x3d7   :  { %v856_v30 = vadd.f32 %v855_v29, %v656_v26  ;;  %v857_v31 = vpop.f32.mrb[6].mxu0 }
 0x3d8   :  { %v862_v32 = vmax.f32 %v854_v28, 0.0  ;;  %v858_v33 = vadd.f32 %v857_v31, %v652_v25  ;;  %v859_v34 = vpop.f32.mrb[7].mxu0 }
 0x3d9   :  { %v863_v35 = vmax.f32 %v856_v30, 0.0  ;;  %v860_v36 = vadd.f32 %v859_v34, %v656_v26 }
 0x3da   :  { %v864_v37 = vmax.f32 %v858_v33, 0.0 }
 0x3db   :  { %v987_v38 = vpack.c.bf16 %v863_v35, %v862_v32  ;;  %v865_v39 = vmax.f32 %v860_v36, 0.0 }
 0x3dd   :  { %878 = vst [vmem:[#allocation11] sm:$0xff] %v987_v38  ;;  %v988_v40 = vpack.c.bf16 %v865_v39, %v864_v37 }
 0x3df   :  { %879 = vst [vmem:[#allocation11 + $0x8] sm:$0xff] %v988_v40 }
 0x3e0   :  { %1248 = shalt.err (!%p1245_p2)
}
 0x3e1   :  { %s1249_s16 = scalar_lea.hbm %s1449_s9, 256 }
 0x3e2   :  { %p1250_p3 = scmp.ne.s32.totalorder %s1449_s9, %s1249_s16  ;;  %p1253_p4 = scmp.lt.u32.totalorder %s1249_s16, %s1449_s9 }
 0x3e4   :  { %p1255_p5 = pnand %p1253_p4, %p1250_p3 }
 0x3e6   :  { %1258 = shalt.err (!%p1255_p5)
}
 0x3e7   :  { %891 = dma.vmem_to_hbm [thread:$0]  %s886_s10, 256, %s1449_s9, [#allocation4], %s1268_s19, %s1268_s19, %s1269_s20  }
 0x3e8   :  { %1265 = dma.done.wait [#allocation4], 256  }
 0x3e9   :  { %1266 = vsyncadd [#allocation4], 4294967040 }
 0x3ea   :  { %895 = vsyncpa [#allocation3], 1 }
 0x3eb   :  { %896 = vsyncpa [#allocation6], 1 }
 0x3ec   :  { %897 = vsyncpa [#allocation9], 1 }
 0x3ed   :  { %898 = vsyncpa [#allocation4], 1 }

</bundles_post_ra>
